<compile_context>
chip_gen: v6e
topology: v6e:2x2x1
jax: 0.10.0
libtpu: 0.0.40
codegen_flags: <defaults>
</compile_context>

<pallas_src>
import jax
import jax.numpy as jnp
import numpy as np
from jax.experimental import pallas as pl
from jax.experimental.pallas import tpu as pltpu


# ----------------------------- kernel -----------------------------
def _rope_kernel(x_ref, cos_ref, sin_ref, o_ref):
    # All refs are (t_rows, L) blocks of the per-batch flattened (seq*dim) layout.
    x = x_ref[...].astype(jnp.float32)
    L = x.shape[-1]
    # pltpu.roll needs non-negative shifts; shift=L-1 == logical roll by -1.
    x_next = pltpu.roll(x, shift=L - 1, axis=1)   # lane i <- x[(i+1) mod L]
    x_prev = pltpu.roll(x, shift=1, axis=1)       # lane i <- x[(i-1) mod L]
    lane = jax.lax.broadcasted_iota(jnp.int32, x.shape, 1)
    # rotate_half: even lane uses -x[next], odd lane uses +x[prev]; the sign is
    # folded into the sin table, so here we only select the neighbour.
    x_rot = jnp.where((lane & 1) == 0, x_next, x_prev)
    out = x * cos_ref[...].astype(jnp.float32) + x_rot * sin_ref[...].astype(jnp.float32)
    o_ref[...] = out.astype(o_ref.dtype)


# ------------------------ table construction ------------------------
def make_rope_tables(dim: int, max_seq_len: int = 512):
    """Raw buffers matching the PyTorch __init__ (cos/sin, repeat_interleave(2))."""
    inv_freq = 1.0 / (10000.0 ** (np.arange(0, dim, 2, dtype=np.float32) / dim))
    positions = np.arange(max_seq_len, dtype=np.float32)
    sinusoid = np.einsum("n,d->nd", positions, inv_freq)        # (max_seq_len, dim//2)
    cos = np.repeat(np.cos(sinusoid), 2, axis=-1)               # (max_seq_len, dim)
    sin = np.repeat(np.sin(sinusoid), 2, axis=-1)
    return jnp.asarray(cos, jnp.float32), jnp.asarray(sin, jnp.float32)


def fold_rope_tables(cos: jax.Array, sin: jax.Array, dtype=jnp.float32):
    """One-time prep: flatten to (max_seq_len*dim,) and fold the rotate_half sign
    into sin (negative on even feature indices, positive on odd)."""
    _, dim = cos.shape
    sign = np.where(np.arange(dim) % 2 == 0, -1.0, 1.0).astype(np.float32)
    cos_flat = cos.reshape(-1).astype(dtype)
    sin_flat = (sin * sign[None, :]).reshape(-1).astype(dtype)
    return cos_flat, sin_flat


# ----------------------------- wrapper -----------------------------
def _choose_lanes(n: int) -> int:
    """Largest convenient multiple of 128 that divides n (n must be % 128 == 0)."""
    for lanes in (2048, 1024, 512, 256, 128):
        if n % lanes == 0:
            return lanes
    return 128


def rotary_embedding(x: jax.Array, cos_flat: jax.Array, sin_flat: jax.Array) -> jax.Array:
    """Apply RoPE to x of shape [batch, seq_len, dim] using pre-folded tables."""
    B, S, D = x.shape
    assert D % 2 == 0, "RoPE requires an even feature dim"
    N = S * D
    assert cos_flat.shape[0] >= N, "seq_len exceeds max_seq_len of the tables"

    cos = cos_flat[:N]
    sin = sin_flat[:N]

    # Pad the flattened per-batch axis up to a multiple of 128 so every block
    # has a full-lane last dim (no masked partial stores).  Pairs never
    # straddle the pad boundary because N is even.
    Np = ((N + 127) // 128) * 128
    xf = x.reshape(B, N)
    if Np != N:
        pad = Np - N
        xf = jnp.pad(xf, ((0, 0), (0, pad)))
        cos = jnp.pad(cos, (0, pad))
        sin = jnp.pad(sin, (0, pad))

    L = _choose_lanes(Np)
    R = Np // L
    x3 = xf.reshape(B, R, L)
    cos2 = cos.reshape(R, L)
    sin2 = sin.reshape(R, L)

    xb = x.dtype.itemsize
    tb = cos2.dtype.itemsize
    row_mult = 16 if xb == 2 else 8

    # dtype-aware target: ~2 MiB x blocks...
    target_rows = max(row_mult, (2 << 20) // (L * xb))
    # ...capped so the double-buffered footprint (x + out + cos + sin) stays
    # well inside v7x's 64 MiB per-core VMEM.
    bytes_per_row = L * (2 * xb + 2 * tb)
    budget = 24 << 20
    target_rows = min(target_rows, max(row_mult, budget // (2 * bytes_per_row)))

    if R <= target_rows:
        t_rows = R
    else:
        t_rows = max(row_mult, (target_rows // row_mult) * row_mult)
    n_row_tiles = pl.cdiv(R, t_rows)

    # v7x has 2 TensorCores: avoid a single-program grid when we can split rows.
    if n_row_tiles * B < 2 and R >= 2 * row_mult:
        half = pl.cdiv(R, 2)
        t_rows = ((half + row_mult - 1) // row_mult) * row_mult
        n_row_tiles = pl.cdiv(R, t_rows)

    out3 = pl.pallas_call(
        _rope_kernel,
        out_shape=jax.ShapeDtypeStruct((B, R, L), x.dtype),
        grid_spec=pltpu.PrefetchScalarGridSpec(
            num_scalar_prefetch=0,
            # Batch innermost: the cos/sin blocks (keyed only by r) stay
            # resident across the batch sweep and are not re-DMA'd.
            grid=(n_row_tiles, B),
            in_specs=[
                pl.BlockSpec((None, t_rows, L), lambda r, b: (b, r, 0)),  # x (batch squeezed)
                pl.BlockSpec((t_rows, L), lambda r, b: (r, 0)),            # cos
                pl.BlockSpec((t_rows, L), lambda r, b: (r, 0)),            # signed sin
            ],
            out_specs=pl.BlockSpec((None, t_rows, L), lambda r, b: (b, r, 0)),
        ),
        compiler_params=pltpu.CompilerParams(
            dimension_semantics=("parallel", "parallel"),
            vmem_limit_bytes=48 << 20,  # fits v7x's 64 MiB; trivial on v5e/v6e
        ),
    )(x3, cos2, sin2)

    out = out3.reshape(B, Np)
    if Np != N:
        out = out[:, :N]
    return out.reshape(B, S, D)


# ---------------- pure-JAX reference (matches the PyTorch module) ----------------
def _rotate_half_ref(x):
    x2 = x.reshape(*x.shape[:-1], x.shape[-1] // 2, 2)
    rot = jnp.stack((-x2[..., 1], x2[..., 0]), axis=-1)
    return rot.reshape(x.shape)


def _rope_ref(x, cos_full, sin_full):
    s = x.shape[1]
    return x * cos_full[:s][None] + _rotate_half_ref(x) * sin_full[:s][None]


if __name__ == "__main__":
    dim, max_seq_len = 32, 512
    cos_full, sin_full = make_rope_tables(dim, max_seq_len)
    cos_flat, sin_flat = fold_rope_tables(cos_full, sin_full, dtype=jnp.float32)

    key = jax.random.PRNGKey(0)

    # Main path: S*D a multiple of 128 (lane-dense refold).
    x = jax.random.normal(key, (2, 8, dim), dtype=jnp.float32)
    out = jax.block_until_ready(rotary_embedding(x, cos_flat, sin_flat))
    ref = _rope_ref(x, cos_full, sin_full)
    assert jnp.allclose(out, ref, atol=1e-5, rtol=1e-5), "mismatch vs reference (aligned path)"

    # Padding path: S*D not a multiple of 128.
    x2 = jax.random.normal(jax.random.PRNGKey(1), (2, 7, dim), dtype=jnp.float32)
    out2 = jax.block_until_ready(rotary_embedding(x2, cos_flat, sin_flat))
    ref2 = _rope_ref(x2, cos_full, sin_full)
    assert jnp.allclose(out2, ref2, atol=1e-5, rtol=1e-5), "mismatch vs reference (padded path)"

    print("KERNEL_OK")
</pallas_src>

<mosaic_0001>
module attributes {stable_mosaic.version = 11 : i64} {
  func.func @_rope_kernel(%arg0: i32, %arg1: i32, %arg2: memref<1x1x256xf32, #tpu.memory_space<vmem>>, %arg3: memref<1x256xf32, #tpu.memory_space<vmem>>, %arg4: memref<1x256xf32, #tpu.memory_space<vmem>>, %arg5: memref<1x1x256xf32, #tpu.memory_space<vmem>>) attributes {dimension_semantics = [#tpu.dimension_semantics<parallel>, #tpu.dimension_semantics<parallel>], iteration_bounds = array<i64: 1, 2>, scalar_prefetch = 0 : i64, scratch_operands = 0 : i64, tpu.core_type = #tpu.core_type<tc>, window_params = [{transform_indices = @transform_0, window_bounds = array<i64: 1, 1, 256>}, {transform_indices = @transform_1, window_bounds = array<i64: 1, 256>}, {transform_indices = @transform_2, window_bounds = array<i64: 1, 256>}, {transform_indices = @transform_3, window_bounds = array<i64: 1, 1, 256>}]} {
    %c0 = arith.constant 0 : index
    %c0_0 = arith.constant 0 : index
    %c0_1 = arith.constant 0 : index
    %0 = vector.load %arg2[%c0, %c0_0, %c0_1] : memref<1x1x256xf32, #tpu.memory_space<vmem>>, vector<1x1x256xf32>
    %1 = vector.shape_cast %0 : vector<1x1x256xf32> to vector<1x256xf32>
    %c255_i32 = arith.constant 255 : i32
    %2 = tpu.dynamic_rotate %1 by %c255_i32 dim 1 : vector<1x256xf32>, i32 -> vector<1x256xf32>
    %c1_i32 = arith.constant 1 : i32
    %3 = tpu.dynamic_rotate %1 by %c1_i32 dim 1 : vector<1x256xf32>, i32 -> vector<1x256xf32>
    %4 = tpu.iota {dimensions = array<i32: 1>} : vector<1x256xi32>
    %c1_i32_2 = arith.constant 1 : i32
    %5 = vector.broadcast %c1_i32_2 : i32 to vector<1x256xi32>
    %6 = arith.andi %4, %5 : vector<1x256xi32>
    %c0_i32 = arith.constant 0 : i32
    %7 = vector.broadcast %c0_i32 : i32 to vector<1x256xi32>
    %8 = arith.cmpi eq, %6, %7 : vector<1x256xi32>
    %9 = arith.select %8, %2, %3 : vector<1x256xi1>, vector<1x256xf32>
    %c0_3 = arith.constant 0 : index
    %c0_4 = arith.constant 0 : index
    %10 = vector.load %arg3[%c0_3, %c0_4] : memref<1x256xf32, #tpu.memory_space<vmem>>, vector<1x256xf32>
    %11 = arith.mulf %1, %10 : vector<1x256xf32>
    %c0_5 = arith.constant 0 : index
    %c0_6 = arith.constant 0 : index
    %12 = vector.load %arg4[%c0_5, %c0_6] : memref<1x256xf32, #tpu.memory_space<vmem>>, vector<1x256xf32>
    %13 = arith.mulf %9, %12 : vector<1x256xf32>
    %14 = arith.addf %11, %13 : vector<1x256xf32>
    %c0_7 = arith.constant 0 : index
    %c0_8 = arith.constant 0 : index
    %c0_9 = arith.constant 0 : index
    %15 = vector.load %arg5[%c0_7, %c0_8, %c0_9] : memref<1x1x256xf32, #tpu.memory_space<vmem>>, vector<1x1x256xf32>
    %16 = vector.shape_cast %15 : vector<1x1x256xf32> to vector<1x256xf32>
    %17 = vector.shape_cast %14 : vector<1x256xf32> to vector<1x1x256xf32>
    tpu.vector_store %arg5[%c0_7, %c0_8, %c0_9], %17 {strides = array<i32>} : memref<1x1x256xf32, #tpu.memory_space<vmem>>, vector<1x1x256xf32>,
    return
  }
  func.func @transform_0(%arg0: i32, %arg1: i32) -> (i32, i32, i32) {
    %c0_i32 = arith.constant 0 : i32
    %c0_i32_0 = arith.constant 0 : i32
    return %arg1, %arg0, %c0_i32 : i32, i32, i32
  }
  func.func @transform_1(%arg0: i32, %arg1: i32) -> (i32, i32) {
    %c0_i32 = arith.constant 0 : i32
    %c0_i32_0 = arith.constant 0 : i32
    return %arg0, %c0_i32 : i32, i32
  }
  func.func @transform_2(%arg0: i32, %arg1: i32) -> (i32, i32) {
    %c0_i32 = arith.constant 0 : i32
    %c0_i32_0 = arith.constant 0 : i32
    return %arg0, %c0_i32 : i32, i32
  }
  func.func @transform_3(%arg0: i32, %arg1: i32) -> (i32, i32, i32) {
    %c0_i32 = arith.constant 0 : i32
    %c0_i32_0 = arith.constant 0 : i32
    return %arg1, %arg0, %c0_i32 : i32, i32, i32
  }
}

</mosaic_0001>

<bundles_post_ra>
// kernel: tpu_custom_call.1
= control target key start
LH: loop header
LB: loop body
LE: loop exit
PB: predicated region body
PF: predicated region fallthrough
CT: control target
= control target key end

     0   :  { %8 = vsyncpa [#allocation3], 0  ;;  %s876_s0 = inlined_call_operand.hbm [shape: f32[2,1,256], index: 0, kind: input, shape index: {}]   ;;  %s877_s1 = inlined_call_operand.hbm [shape: f32[1,256], index: 1, kind: input, shape index: {}]   ;;  %s878_s2 = inlined_call_operand.vmem [shape: f32[1,256], index: 2, kind: input, shape index: {}]   ;;  %s879_s3 = inlined_call_operand.hbm [shape: f32[2,1,256], index: 3, kind: output, shape index: {}]  }
   0x1   :  { %10 = vsyncpa [#allocation3 + $0x1], 0 }
   0x2   :  { %11 = vsyncpa [#allocation6], 0 }
   0x3   :  { %12 = vsyncpa [#allocation4], 0 }
   0x4   :  { %14 = vsyncpa [#allocation4 + $0x1], 0  ;;  %s708_s12 = smov 0   ;;  %s710_s13 = smov 0  }
   0x5   :  { %s712_s14 = smov 0   ;;  %s714_s15 = smov 0  }
   0x6   :  { %s716_s16 = smov 0   ;;  %s718_s17 = smov 0  }
   0x7 LB: > { %s446_s18 = sadd.s32 4294967295, %s680_s17   ;;  %s447_s19 = sadd.s32 4294967294, %s680_s17   ;;  %s680_s17 = sphi %s718_s17, %s20_s17   ;;  %s676_s16 = sphi %s716_s16, %s896_s16   ;;  %s672_s15 = sphi %s714_s15, %s895_s15   ;;  %s668_s14 = sphi %s712_s14, %s894_s14   ;;  %s664_s13 = sphi %s710_s13, %s893_s13   ;;  %s660_s12 = sphi %s708_s12, %s892_s12  }
   0x8   : > { %p54_p0 = scmp.ne.s32.totalorder %s664_s13, %s660_s12  ;;  %p742_p1 = scmp.eq.s32.totalorder %s446_s18, 0 }
   0x9   : > { %p746_p2 = scmp.eq.s32.totalorder %s446_s18, 1  ;;  %p138_p3 = scmp.eq.s32.totalorder %s447_s19, 1 }
   0xa   : > { %p752_p4 = por %p742_p1, %p54_p0  ;;  %p448_p5 = scmp.ge.s32.totalorder %s680_s17, 1 }
   0xb   : > { %p757_p6 = por %p138_p3, %p54_p0  ;;  %p145_p7 = scmp.lt.s32.totalorder %s680_s17, 3 }
   0xc   : > { %s883_s22 = scalar_select %p752_p4, 1, 0 }
   0xd   : > { %s884_s23 = scalar_select %p757_p6, 1, 0 }
   0xe   : > { %p762_p8 = pnand %p448_p5, %p145_p7  ;;  %s682_s25 = smov [#allocation5]  }
   0xf   : > { %s161_s26 = sshll.u32 %s682_s25, 4  ;;  %s29_s28 = sadd.s32 1, %s676_s16  ;;  %s162_s26 = int_to_ptr.vmem [resolvable:$true] %s161_s26 }
  0x10   : > { %p474_p10 = pneg %p762_p8  ;;  %s41_s29 = sadd.s32 1, %s668_s14 }
  0x11   : > { %p30_p12 = scmp.ge.s32.totalorder %s29_s28, 2  ;;  %s553_s30 = scalar_lea.vmem %s162_s26, 32 }
  0x12   : > { %p771_p11 = pnand %p474_p10, %p742_p1  ;;  %p554_p0 = scmp.ne.s32.totalorder %s162_s26, %s553_s30 }
  0x13   : > { %p561_p7 = scmp.lt.s32.totalorder %s162_s26, %s162_s26  ;;  %p562_p6 = scmp.lt.s32.totalorder %s553_s30, %s553_s30 }
  0x14   : > { %p544_p13 = pneg %p771_p11 }
  0x15   : > { %p563_p9 = por %p562_p6, %p561_p7 }
  0x16   : > { %p556_p3 = pnand %p554_p0, %p544_p13 }
  0x18   : > { %p557_p5 = pneg %p556_p3 }
  0x1a   : > { %p564_p4 = pnand %p563_p9, %p557_p5 }
  0x1c   : > { %567 = shalt.err (!%p564_p4)
}
  0x1d   : > { %477 = dma.hbm_to_vmem [thread:$0]  (!%p771_p11), %s877_s1, 32, %s162_s26, [#allocation6]  }
  0x1e   : > { %s898_s28 = smov (%p30_p12, %s29_s28), 0  ;;  %p48_p6 = scmp.ne.s32.totalorder %s668_s14, %s664_s13 }
  0x1f   : > { %p49_p4 = scmp.eq.s32.totalorder %s680_s17, 0  ;;  %s36_s6 = ssub.s32 %s676_s16, %s898_s28 }
  0x20   : > { %p487_p9 = scmp.lt.s32.totalorder %s680_s17, 2  ;;  %p39_p10 = scmp.eq.s32.totalorder %s36_s6, 0 }
  0x21   : > { %p50_p13 = por %p49_p4, %p48_p6  ;;  %p794_p0 = por %p746_p2, %p48_p6 }
  0x22   : > { %s179_s8 = sand.u32 1, %s668_s14   ;;  %s464_s11 = sshll.u32 %s676_s16, 5 }
  0x23   : > { %s800_s9 = scalar_select %p39_p10, %s668_s14, %s41_s29  }
  0x24   : > { %s452_s10 = sshll.u32 %s179_s8, 1  ;;  %s191_s25 = scalar_lea.hbm %s876_s0, %s464_s11 }
  0x25   : > { %s183_s26 = scalar_lea.vmem [#allocation2], %s452_s10  ;;  %p806_p11 = pnand %p487_p9, %p50_p13 }
  0x26   : > { %s193_s27 = sshll.u32 %s183_s26, 4  ;;  %s180_s21 = scalar_lea.sflag [#allocation3], %s179_s8  ;;  %s194_s27 = int_to_ptr.vmem [resolvable:$true] %s193_s27 }
  0x27   : > { %p570_p2 = pneg %p806_p11  ;;  %s581_s4 = scalar_lea.vmem %s194_s27, 32 }
  0x28   : > { %p582_p12 = scmp.ne.s32.totalorder %s194_s27, %s581_s4  ;;  %s683_s29 = smov [#allocation2]  }
  0x29   : > { %s586_s5 = sshll.u32 %s683_s29, 4  ;;  %s587_s5 = int_to_ptr.vmem [resolvable:$false] %s586_s5 }
  0x2a   : > { %p584_p3 = pnand %p582_p12, %p570_p2  ;;  %s588_s6 = scalar_lea.vmem %s587_s5, 64 }
  0x2b   : > { %p589_p7 = scmp.lt.s32.totalorder %s194_s27, %s587_s5  ;;  %p590_p6 = scmp.lt.s32.totalorder %s588_s6, %s581_s4 }
  0x2c   : > { %p585_p5 = pneg %p584_p3 }
  0x2d   : > { %p591_p4 = por %p590_p6, %p589_p7 }
  0x2f   : > { %p592_p10 = pnand %p591_p4, %p585_p5 }
  0x31   : > { %595 = shalt.err (!%p592_p10)
}
  0x32   : > { %481 = dma.hbm_to_vmem [thread:$0]  (!%p806_p11), %s191_s25, 32, %s194_s27, %s180_s21  }
  0x33   : > { %202 = sbr.rel (%p762_p8) target bundleno = 211 (0xd3), region = 32  ;;  %s817_s8 = sand.u32 (!%p762_p8), 1, %s664_s13  }
  0x34   : > { %s456_s10 = sshll.u32 (!%p762_p8), %s817_s8, 1  ;;  %s205_s11 = scalar_lea.sflag (!%p762_p8), [#allocation3], %s817_s8 }
  0x35   : > { %s208_s18 = scalar_lea.vmem (!%p762_p8), [#allocation2], %s456_s10  ;;  %p889_p9 = scmp.ne.s32.totalorder (!%p762_p8), %s883_s22, 0 }
  0x38   : > { %647 = dma.done.wait (%p889_p9), %s205_s11, 32  }
  0x39   : > { %649 = vsyncadd (%p889_p9), %s205_s11, 4294967264 }
  0x3a   : > { %651 = dma.done.wait (%p742_p1), [#allocation6], 32  }
  0x3b   : > { %653 = vsyncadd (%p742_p1), [#allocation6], 4294967264  ;;  %v245_v0 = vlaneseq  ;;  %v243_v4 = vld [vmem:[%s208_s18] sm:$0x3]  ;;  %s684_s24 = smov 1   ;;  %s685_s19 = smov 127  }
  0x3c   : > { %v686_v9 = vmov 1966171168   ;;  %v280_v13 = vld [vmem:[%s878_s2] sm:$0x3]  ;;  %v278_v30 = vld [vmem:[#allocation5] sm:$0x3] }
  0x3d   : > { %v246_v1 = vshrl.u32 %v245_v0, 7  ;;  %v260_v7 = vand.u32 127, %v245_v0  ;;  %v298_v10 = vunpack.c.l.s4 %v686_v9  ;;  %v279_v32 = vmul.f32 %v278_v30, %v243_v4  ;;  %s465_s25 = sshll.u32 %s672_s15, 5  ;;  %s238_s26 = scalar_lea.vmem [#allocation7], %s456_s10 }
  0x3e   : > { %s335_s27 = sshll.u32 %s238_s26, 4  ;;  %vm315_vm4 = vcmp.lt.s32.totalorder %v245_v0, 256  ;;  %s333_s4 = scalar_lea.hbm %s879_s3, %s465_s25  ;;  %s336_s27 = int_to_ptr.vmem [resolvable:$true] %s335_s27 }
  0x3f   : > { %v247_v2 = vsub.s32 0, %v246_v1  ;;  %v251_v3 = vsub.s32 1, %v246_v1  ;;  %v271_v8 = vadd.s32 128, %v260_v7  ;;  %v272_v11 = vand.u32 1, %v260_v7  ;;  %s319_s29 = scalar_lea.sflag [#allocation4], %s817_s8  ;;  %s596_s5 = scalar_lea.vmem %s336_s27, 32 }
  0x40   : > { %vm268_vm0 = vcmp.lt.s32.totalorder %v260_v7, 1  ;;  %vm261_vm1 = vcmp.lt.s32.totalorder %v260_v7, 127  ;;  %v299_v16 = vunpack.c.0.s8 %v298_v10  ;;  %p597_p1 = scmp.ne.s32.totalorder %s336_s27, %s596_s5  ;;  %s687_s6 = smov [#allocation7]  }
  0x41   : > { %v248_v5 = vrot.slane %v243_v4, %v247_v2  ;;  %v252_v6 = vrot.slane %v243_v4, %v251_v3  ;;  %v273_v12 = vand.u32 1, %v271_v8  ;;  %v285_v17 = vrot.slane %v280_v13, %v247_v2  ;;  %s600_s15 = sshll.u32 %s687_s6, 4  ;;  %s601_s15 = int_to_ptr.vmem [resolvable:$false] %s600_s15 }
  0x42   : > { %vm274_vm2 = vcmp.eq.s32.totalorder %v272_v11, 0  ;;  %v289_v18 = vrot.slane %v280_v13, %v251_v3  ;;  %v302_v27 = vsub.s32 %v299_v16, %v246_v1  ;;  %p598_p8 = pnand %p597_p1, %p794_p0  ;;  %s602_s10 = scalar_lea.vmem %s601_s15, 64 }
  0x43   : > { %264 = vrot.lane.b32.xlu1 %v248_v5, %s684_s24  ;;  %255 = vrot.lane.b32.xlu0 %v248_v5, %s685_s19  ;;  %vm275_vm3 = vcmp.eq.s32.totalorder %v273_v12, 0  ;;  %p603_p11 = scmp.lt.s32.totalorder %s336_s27, %s601_s15  ;;  %p604_p2 = scmp.lt.s32.totalorder %s602_s10, %s596_s5 }
  0x44   : > { %p599_p13 = pneg %p598_p8 }
  0x45   : > { %p605_p12 = por %p604_p2, %p603_p11 }
  0x47   : > { %266 = vrot.lane.b32.xlu1 %v252_v6, %s684_s24  ;;  %257 = vrot.lane.b32.xlu0 %v252_v6, %s685_s19  ;;  %p606_p3 = pnand %p605_p12, %p599_p13 }
  0xb5   : > { %v265_v14 = vpop.permute.xlu1 %264  ;;  %v256_v15 = vpop.permute.xlu0 %255 }
  0xb9   : > { %v267_v19 = vpop.permute.xlu1 %266  ;;  %v258_v20 = vpop.permute.xlu0 %257 }
  0xba   : > { %v269_v21 = vsel %vm268_vm0, %v265_v14, %v267_v19  ;;  %v270_v22 = vsel %vm268_vm0, %v267_v19, %v265_v14  ;;  %v262_v23 = vsel %vm261_vm1, %v256_v15, %v258_v20  ;;  %v263_v24 = vsel %vm261_vm1, %v258_v20, %v256_v15 }
  0xbb   : > { %v276_v25 = vsel %vm274_vm2, %v262_v23, %v270_v22  ;;  %v277_v26 = vsel %vm275_vm3, %v263_v24, %v269_v21 }
  0xbc   : > { %v292_v28 = vmul.f32 %v285_v17, %v276_v25  ;;  %v293_v29 = vmul.f32 %v289_v18, %v277_v26 }
  0xbe   : > { %v296_v31 = vcombine.low %v292_v28, %v293_v29 }
  0xc0   : > { %v303_v33 = vrot.slane %v296_v31, %v302_v27 }
  0xc2   : > { %v310_v34 = vrot.slane %v303_v33, %v302_v27 }
  0xc4   : > { %v312_v35 = vadd.f32 %v310_v34, %v279_v32 }
  0xc6   : > { %317 = vst.msk [vmem:[%s238_s26] sm:$0x3] %vm315_vm4, %v312_v35 }
  0xc7   : > { %609 = shalt.err (!%p606_p3)
}
  0xc8   : > { %s610_s11 = scalar_lea.hbm %s333_s4, 32  ;;  %s614_s24 = scalar_lea.hbm %s879_s3, 64 }
  0xc9   : > { %p611_p5 = scmp.ne.s32.totalorder %s333_s4, %s610_s11  ;;  %p615_p4 = scmp.lt.s32.totalorder %s333_s4, %s879_s3 }
  0xca   : > { %p616_p10 = scmp.lt.s32.totalorder %s614_s24, %s610_s11 }
  0xcb   : > { %p612_p7 = pnand %p611_p5, %p794_p0 }
  0xcc   : > { %p617_p9 = por %p616_p10, %p615_p4 }
  0xcd   : > { %p613_p6 = pneg %p612_p7 }
  0xcf   : > { %p618_p1 = pnand %p617_p9, %p613_p6 }
  0xd1   : > { %621 = shalt.err (!%p618_p1)
}
  0xd2   : > { %472 = dma.vmem_to_hbm [thread:$0]  (%p794_p0), %s336_s27, 32, %s333_s4, %s319_s29  }
  0xd3 PF: > { %s347_s22 = sand.u32 1, %s660_s12   ;;  %p890_p8 = scmp.ne.s32.totalorder %s884_s23, 0 }
  0xd4   : > { %p891_p13 = scmp.ge.s32.totalorder %s680_s17, 2  ;;  %s348_s25 = scalar_lea.sflag [#allocation4], %s347_s22 }
  0xd6   : > { %p483_p11 = pnand %p891_p13, %p890_p8 }
  0xd8   : > { %p484_p2 = pneg %p483_p11 }
  0xda   : > { %655 = dma.done.wait (%p484_p2), %s348_s25, 32  }
  0xdb   : > { %657 = vsyncadd (%p484_p2), %s348_s25, 4294967264  ;;  %s20_s17 = sadd.s32 1, %s680_s17   ;;  %s892_s12 = smov %s664_s13 }
  0xdc   : > { %p17_p12 = scmp.ge.s32.totalorder %s20_s17, 4   ;;  %s893_s13 = smov %s668_s14 }
  0xdd   : > { %s894_s14 = smov %s800_s9  ;;  %s895_s15 = smov %s676_s16 }
  0xde   : > { %s896_s16 = smov %s898_s28  ;;  %19 = sbr.rel (!%p17_p12) target bundleno = 7 (0x7), region = 85 }
  0xe3   :  { %353 = vsyncpa [#allocation3], 1 }
  0xe4   :  { %355 = vsyncpa [#allocation3 + $0x1], 1 }
  0xe5   :  { %356 = vsyncpa [#allocation6], 1 }
  0xe6   :  { %357 = vsyncpa [#allocation4], 1 }
  0xe7   :  { %359 = vsyncpa [#allocation4 + $0x1], 1 }

</bundles_post_ra>
